<compile_context>
chip_gen: v7x
topology: tpu7x:2x2x1
jax: 0.10.0
libtpu: 0.0.40
codegen_flags: <defaults>
</compile_context>

<pallas_src>
import numpy as np

import jax
import jax.numpy as jnp
from jax.experimental import pallas as pl
from jax.experimental.pallas import tpu as pltpu


def _drop_path_kernel(scale_ref, x_ref, o_ref):
    # scale_ref: (tb, 1) f32 per-sample scale (0 or 1/keep_prob); broadcasts
    # over the lane-dense feature tile.  Pure VPU broadcast-multiply.
    o_ref[...] = (x_ref[...] * scale_ref[...]).astype(o_ref.dtype)


def _round_up(n, m):
    return ((n + m - 1) // m) * m


def _largest_divisor(n, unit, max_tile):
    """Largest multiple of `unit` dividing `n`, at most `max_tile` (>= unit).

    Precondition: n % unit == 0.
    """
    max_tile = min(n, max(unit, max_tile - max_tile % unit))
    best = unit
    for cand in range(unit, max_tile + 1, unit):
        if n % cand == 0:
            best = cand
    return best


def _auto_tile_budget_bytes():
    """Per-tile byte budget and optional scoped-VMEM override (generation-aware)."""
    budget = 2 << 20          # safe everywhere: 2x(in) + 2x(out) double-buffered
    vmem_limit = None         # = 8 MiB, inside v5e's 16 MiB scoped default.
    try:
        info = pltpu.get_tpu_info()
        vmem = getattr(info, "vmem_capacity_bytes", None)
        if vmem is not None and vmem <= (64 << 20):
            # v7x: 64 MiB physical VMEM / ~3.2 TB/s HBM per TC -> bigger tiles
            # amortize the ~0.35us per-step pipeline overhead.
            budget = 4 << 20
            vmem_limit = 28 << 20
    except Exception:
        pass  # conservative fallback
    return budget, vmem_limit


def drop_path_pallas(x, drop_prob: float = 0.0, training: bool = False, key=None,
                     *, donate_x: bool = False, small_bypass_bytes: int = 128 << 10,
                     force_pallas: bool = False, tile_budget_bytes=None):
    """Pallas DropPath. x: (B, C, H, W) NCHW (any trailing dims work)."""
    if drop_prob == 0.0 or not training:
        return x
    if key is None:
        # TODO(synk): callers should pass a fresh key; a fixed default makes
        # "stochastic" depth deterministic across calls.
        key = jax.random.PRNGKey(0)

    keep_prob = 1.0 - float(drop_prob)
    orig_shape = x.shape
    b = int(orig_shape[0])
    f = int(np.prod(orig_shape[1:]))
    itemsize = jnp.dtype(x.dtype).itemsize

    # Per-sample keep mask (tiny), computed once in the wrapper (f32 scale).
    u = jax.random.uniform(key, (b, 1), dtype=jnp.float32)
    mask = jnp.floor(keep_prob + u)                    # {0., 1.} per sample
    scale = mask * jnp.float32(1.0 / keep_prob)        # 0 or 1/keep_prob

    # Tiny inputs: launch + a single non-pipelined grid step dominates; let
    # XLA fuse the broadcast-multiply instead.
    if (b * f * itemsize) <= small_bypass_bytes and not force_pallas:
        bshape = (b,) + (1,) * (x.ndim - 1)
        return (x * scale.reshape(bshape)).astype(x.dtype)

    # ---------------- tiling ----------------
    if tile_budget_bytes is None:
        budget, vmem_limit = _auto_tile_budget_bytes()
    else:
        budget, vmem_limit = int(tile_budget_bytes), None
    su = {1: 32, 2: 16, 4: 8}.get(itemsize, 8)         # sublane packing unit

    f_pad = _round_up(f, 128)                          # lane-dense stores
    row_bytes = f_pad * itemsize

    if b * row_bytes <= budget:
        # Whole (F-padded) array is a single tile.
        b_pad, tb, tf = b, b, f_pad
        # v7x megacore: guarantee >=2 steps on a parallel axis when the
        # array is big enough to be worth sharding across both TensorCores.
        if b * row_bytes > (256 << 10):
            if b % (2 * su) == 0:
                tb = b // 2
            elif f_pad % 256 == 0:
                tf = f_pad // 2
    elif su * row_bytes <= budget:
        # Full feature rows (one contiguous HBM run per row); tile the batch.
        b_pad = b if b % su == 0 else _round_up(b, su)
        tf = f_pad
        tb = _largest_divisor(b_pad, su, budget // row_bytes)
    else:
        # A single feature row exceeds the budget: tile both axes.
        b_pad = b if b % su == 0 else _round_up(b, su)
        tb = su
        tf = _largest_divisor(f_pad, 128, budget // (tb * itemsize))

    x2d = x.reshape(b, f)                              # contiguous: free
    if (b_pad, f_pad) != (b, f):
        x2d = jnp.pad(x2d, ((0, b_pad - b), (0, f_pad - f)))
        scale = jnp.pad(scale, ((0, b_pad - b), (0, 0)))

    grid = (b_pad // tb, f_pad // tf)

    out2d = pl.pallas_call(
        _drop_path_kernel,
        out_shape=jax.ShapeDtypeStruct((b_pad, f_pad), x.dtype),
        grid=grid,
        in_specs=[
            pl.BlockSpec((tb, 1), lambda i, j: (i, 0)),    # per-sample scale
            pl.BlockSpec((tb, tf), lambda i, j: (i, j)),   # x tile
        ],
        out_specs=pl.BlockSpec((tb, tf), lambda i, j: (i, j)),
        compiler_params=pltpu.CompilerParams(
            dimension_semantics=("parallel", "parallel"),
            vmem_limit_bytes=vmem_limit),
        input_output_aliases=({1: 0} if donate_x else {}),
    )(scale, x2d)

    if (b_pad, f_pad) != (b, f):
        out2d = out2d[:b, :f]
    return out2d.reshape(orig_shape)


def _check_valid_drop_path(x_np, out_np, keep_prob, rtol=1e-5, atol=1e-5):
    """Each sample must be all-zeros or (approximately) x / keep_prob."""
    for bidx in range(x_np.shape[0]):
        kept = x_np[bidx].astype(np.float32) / keep_prob
        o = out_np[bidx].astype(np.float32)
        is_zero = np.allclose(o, 0.0, atol=atol)
        is_kept = np.allclose(o, kept, rtol=rtol, atol=atol)
        assert is_zero or is_kept, f"sample {bidx}: not a valid drop-path output"


if __name__ == "__main__":
    root = jax.random.PRNGKey(0)
    k1, k2, k3, k4, k5, k6, k7, k8 = jax.random.split(root, 8)

    drop_prob = 0.25
    keep_prob = 1.0 - drop_prob

    # 1) Module-spec shape (NCHW), F = 4*16*16 = 1024.  Forced through the
    #    Pallas path (it is below the tiny-input bypass threshold otherwise).
    x = jax.random.normal(k1, (2, 4, 16, 16), dtype=jnp.float32)
    out = jax.block_until_ready(
        drop_path_pallas(x, drop_prob, training=True, key=k2, force_pallas=True))
    _check_valid_drop_path(np.asarray(x), np.asarray(out), keep_prob)

    # 1b) Same input through the tiny-input bypass; must match the kernel.
    out_b = jax.block_until_ready(drop_path_pallas(x, drop_prob, training=True, key=k2))
    np.testing.assert_allclose(np.asarray(out_b), np.asarray(out), rtol=1e-6, atol=1e-6)

    # 2) F not a multiple of 128 (300 -> padded to 384): lane-dense pad path.
    x2 = jax.random.normal(k3, (8, 3, 10, 10), dtype=jnp.float32)
    out2 = jax.block_until_ready(
        drop_path_pallas(x2, drop_prob, training=True, key=k4, force_pallas=True))
    _check_valid_drop_path(np.asarray(x2), np.asarray(out2), keep_prob)

    # 3) Larger f32 (1 MiB): single tile fits the budget, megacore split
    #    kicks in -> grid has >=2 parallel steps.
    x3 = jax.random.normal(k5, (32, 8, 32, 32), dtype=jnp.float32)
    out3 = jax.block_until_ready(drop_path_pallas(x3, drop_prob, training=True, key=k6))
    _check_valid_drop_path(np.asarray(x3), np.asarray(out3), keep_prob)

    # 4) bf16 (sublane unit 16), forced through the kernel; loose tolerance
    #    for the in-dtype rounding of 1/keep_prob.
    x4 = jax.random.normal(k7, (16, 8, 16, 16), dtype=jnp.bfloat16)
    out4 = jax.block_until_ready(
        drop_path_pallas(x4, drop_prob, training=True, key=k8, force_pallas=True))
    _check_valid_drop_path(np.asarray(x4), np.asarray(out4), keep_prob,
                           rtol=2e-2, atol=2e-2)

    # 5) Tiny explicit budgets exercise the guarded fallback paths at small
    #    shapes: (a) batch padding + feature tiling, (b) batch tiling with
    #    full feature rows.
    x5 = jax.random.normal(k1, (6, 4, 16, 16), dtype=jnp.float32)     # B=6 (pad->8)
    out5 = jax.block_until_ready(
        drop_path_pallas(x5, drop_prob, training=True, key=k2,
                         force_pallas=True, tile_budget_bytes=8 << 10))
    _check_valid_drop_path(np.asarray(x5), np.asarray(out5), keep_prob)

    x6 = jax.random.normal(k3, (24, 4, 16, 16), dtype=jnp.float32)    # batch-tiled
    out6 = jax.block_until_ready(
        drop_path_pallas(x6, drop_prob, training=True, key=k4,
                         force_pallas=True, tile_budget_bytes=48 << 10))
    _check_valid_drop_path(np.asarray(x6), np.asarray(out6), keep_prob)

    # 6) Identity paths (eval mode / drop_prob == 0) match input exactly.
    out_eval = drop_path_pallas(x, drop_prob, training=False)
    assert np.array_equal(np.asarray(out_eval), np.asarray(x))
    out_p0 = drop_path_pallas(x, 0.0, training=True, key=k2)
    assert np.array_equal(np.asarray(out_p0), np.asarray(x))

    print("KERNEL_OK")
</pallas_src>

<mosaic_0001>
module attributes {stable_mosaic.version = 11 : i64} {
  func.func @_drop_path_kernel(%arg0: i32, %arg1: i32, %arg2: memref<2x1xf32, #tpu.memory_space<vmem>>, %arg3: memref<2x1024xf32, #tpu.memory_space<vmem>>, %arg4: memref<2x1024xf32, #tpu.memory_space<vmem>>) attributes {dimension_semantics = [#tpu.dimension_semantics<parallel>, #tpu.dimension_semantics<parallel>], iteration_bounds = array<i64: 1, 1>, scalar_prefetch = 0 : i64, scratch_operands = 0 : i64, tpu.core_type = #tpu.core_type<tc>, window_params = [{transform_indices = @transform_0, window_bounds = array<i64: 2, 1>}, {transform_indices = @transform_1, window_bounds = array<i64: 2, 1024>}, {transform_indices = @transform_2, window_bounds = array<i64: 2, 1024>}]} {
    %c0 = arith.constant 0 : index
    %c0_0 = arith.constant 0 : index
    %0 = vector.load %arg3[%c0, %c0_0] : memref<2x1024xf32, #tpu.memory_space<vmem>>, vector<2x1024xf32>
    %c0_1 = arith.constant 0 : index
    %c0_2 = arith.constant 0 : index
    %1 = vector.load %arg2[%c0_1, %c0_2] : memref<2x1xf32, #tpu.memory_space<vmem>>, vector<2x1xf32>
    %2 = vector.broadcast %1 : vector<2x1xf32> to vector<2x1024xf32>
    %3 = arith.mulf %0, %2 : vector<2x1024xf32>
    %c0_3 = arith.constant 0 : index
    %c0_4 = arith.constant 0 : index
    %4 = vector.load %arg4[%c0_3, %c0_4] : memref<2x1024xf32, #tpu.memory_space<vmem>>, vector<2x1024xf32>
    tpu.vector_store %arg4[%c0_3, %c0_4], %3 {strides = array<i32>} : memref<2x1024xf32, #tpu.memory_space<vmem>>, vector<2x1024xf32>,
    return
  }
  func.func @transform_0(%arg0: i32, %arg1: i32) -> (i32, i32) {
    %c0_i32 = arith.constant 0 : i32
    %c0_i32_0 = arith.constant 0 : i32
    return %arg0, %c0_i32 : i32, i32
  }
  func.func @transform_1(%arg0: i32, %arg1: i32) -> (i32, i32) {
    %c0_i32 = arith.constant 0 : i32
    return %arg0, %arg1 : i32, i32
  }
  func.func @transform_2(%arg0: i32, %arg1: i32) -> (i32, i32) {
    %c0_i32 = arith.constant 0 : i32
    return %arg0, %arg1 : i32, i32
  }
}

</mosaic_0001>

<bundles_post_ra>
// kernel: tpu_custom_call.1
= control target key start
LH: loop header
LB: loop body
LE: loop exit
PB: predicated region body
PF: predicated region fallthrough
CT: control target
= control target key end

     0   :  { %7 = vsyncpa [#allocation3], 0  ;;  %s157_s0 = inlined_call_operand.vmem [shape: f32[2,1], index: 0, kind: input, shape index: {}]   ;;  %s158_s1 = inlined_call_operand.hbm [shape: f32[2,1024], index: 1, kind: input, shape index: {}]   ;;  %s159_s2 = inlined_call_operand.hbm [shape: f32[2,1024], index: 2, kind: output, shape index: {}]  }
   0x1   :  { %8 = vsyncpa [#allocation4], 0  ;;  %s111_s9 = smov [#allocation2]   ;;  %s63_s13 = scalar_lea.hbm %s158_s1, 256 }
   0x2   :  { %s17_s10 = sshll.u32 %s111_s9, 4  ;;  %p64_p0 = scmp.ne.s32.totalorder %s158_s1, %s63_s13  ;;  %s18_s10 = int_to_ptr.vmem [resolvable:$true] %s17_s10 }
   0x3   :  { %p67_p1 = scmp.lt.u32.totalorder %s63_s13, %s158_s1 }
   0x5   :  { %p69_p2 = pnand %p67_p1, %p64_p0 }
   0x7   :  { %72 = shalt.err (!%p69_p2)
}
   0x8   :  { %s73_s18 = scalar_lea.vmem %s18_s10, 256  ;;  %p78_p4 = scmp.lt.s32.totalorder %s18_s10, %s18_s10 }
   0x9   :  { %p74_p3 = scmp.ne.s32.totalorder %s18_s10, %s73_s18  ;;  %p79_p5 = scmp.lt.s32.totalorder %s73_s18, %s73_s18 }
   0xb   :  { %p80_p6 = por %p79_p5, %p78_p4 }
   0xd   :  { %p81_p7 = pnand %p80_p6, %p74_p3 }
   0xf   :  { %84 = shalt.err (!%p81_p7)
}
  0x10   :  { %20 = dma.hbm_to_vmem [thread:$0]  %s158_s1, 256, %s18_s10, [#allocation3]  }
  0x11   :  { %107 = dma.done.wait [#allocation3], 256  }
  0x12   :  { %108 = vsyncadd [#allocation3], 4294967040  ;;  %v112_v0 = vmov 0   ;;  %v26_v1 = vld [vmem:[%s157_s0] sm:$0x3]  ;;  %v34_v4 = vlaneseq  ;;  %v25_v10 = vld [vmem:[#allocation2 + $0x8] sm:$0xff] }
  0x13   :  { %62 = vset.pattern.permute.xlu0 %v112_v0  ;;  %v113_v2 = vmov 269488144   ;;  %v24_v9 = vld [vmem:[#allocation2] sm:$0xff]  ;;  %s114_s23 = smov [#allocation5]  }
  0x14   :  { %29 = vperm.xlu0 %62, %v26_v1   ;;  %v32_v3 = vunpack.c.l.s4 %v113_v2  ;;  %v35_v6 = vshrl.u32 %v34_v4, 7  ;;  %s49_s1 = sshll.u32 %s114_s23, 4  ;;  %s50_s1 = int_to_ptr.vmem [resolvable:$true] %s49_s1 }
  0x15   :  { %s85_s24 = scalar_lea.vmem %s50_s1, 256  ;;  %p90_p9 = scmp.lt.s32.totalorder %s50_s1, %s50_s1 }
  0x16   :  { %v33_v5 = vunpack.c.0.s8 %v32_v3  ;;  %p86_p8 = scmp.ne.s32.totalorder %s50_s1, %s85_s24  ;;  %p91_p10 = scmp.lt.s32.totalorder %s85_s24, %s85_s24 }
  0x18   :  { %v36_v7 = vsub.s32 %v33_v5, %v35_v6  ;;  %p92_p11 = por %p91_p10, %p90_p9 }
  0x1a   :  { %p93_p12 = pnand %p92_p11, %p86_p8 }
  0x93   :  { %v30_v8 = vpop.permute.xlu0 %29 }
  0x94   :  { %v37_v11 = vrot.slane %v30_v8, %v36_v7 }
  0x96   :  { %v39_v12 = vmul.f32 %v37_v11, %v24_v9  ;;  %v40_v13 = vmul.f32 %v37_v11, %v25_v10 }
  0x98   :  { %41 = vst [vmem:[#allocation5] sm:$0xff] %v39_v12  ;;  %42 = vst [vmem:[#allocation5 + $0x8] sm:$0xff] %v40_v13 }
  0x99   :  { %96 = shalt.err (!%p93_p12)
}
  0x9a   :  { %s97_s26 = scalar_lea.hbm %s159_s2, 256 }
  0x9b   :  { %p98_p13 = scmp.ne.s32.totalorder %s159_s2, %s97_s26  ;;  %p101_p0 = scmp.lt.u32.totalorder %s97_s26, %s159_s2 }
  0x9d   :  { %p103_p1 = pnand %p101_p0, %p98_p13 }
  0x9f   :  { %106 = shalt.err (!%p103_p1)
}
  0xa0   :  { %52 = dma.vmem_to_hbm [thread:$0]  %s50_s1, 256, %s159_s2, [#allocation4]  }
  0xa1   :  { %109 = dma.done.wait [#allocation4], 256  }
  0xa2   :  { %110 = vsyncadd [#allocation4], 4294967040 }
  0xa3   :  { %56 = vsyncpa [#allocation3], 1 }
  0xa4   :  { %57 = vsyncpa [#allocation4], 1 }

</bundles_post_ra>
